<compile_context>
chip_gen: v7x
topology: tpu7x:2x2x1
jax: 0.10.0
libtpu: 0.0.40
codegen_flags: <defaults>
</compile_context>

<pallas_src>
import functools

import jax
import jax.numpy as jnp
from jax import lax
from jax.experimental import pallas as pl
from jax.experimental.pallas import tpu as pltpu

_LANE = 128
_SUB = 8


def _round_up(a, b):
    return -(-a // b) * b


def _pick_tile(rows, n_elems, row_mult, ts_max):
    """Pick (tile_rows, num_tiles) with minimal pred padding.

    Preference: single tile; else an exact divisor of `rows` (zero pred pad /
    no HBM pad copy when N is lane aligned); else balanced round-up tiles
    (padding bounded by ~row_mult rows per tile).
    """
    rows_r = _round_up(rows, row_mult)
    if rows_r <= ts_max:
        return rows_r, 1
    if n_elems == rows * _LANE and rows % row_mult == 0:
        m = rows // row_mult
        best = 0
        d = 1
        while d * d <= m:
            if m % d == 0:
                for dd in (d, m // d):
                    cand = dd * row_mult
                    if cand <= ts_max:
                        best = max(best, cand)
            d += 1
        if best >= min(256, ts_max):
            return best, rows // best
    num_tiles = -(-rows_r // ts_max)
    ts = _round_up(-(-rows_r // num_tiles), row_mult)
    return ts, num_tiles


def _pick_chunk(ts, row_mult):
    """Largest chunk <= 256 rows that divides ts and respects dtype packing."""
    if ts <= 256:
        return ts
    c = (256 // row_mult) * row_mult
    while c > row_mult:
        if ts % c == 0:
            return c
        c -= row_mult
    return row_mult


def _geo_scal_sums_kernel(pred_ref, gt_ref, out_ref, *, class_id, ignore_index,
                          check_ignore, n_valid, ts, chunk, num_tiles,
                          tiles_per_split, need_mask):
    """Accumulate per-(batch, split) partial sums for the reverse geo-scal loss.

    pred_ref: (1, C, TS, 128) logits tile (native dtype; upcast per channel here).
    gt_ref:   (1, TS, 128) integer labels tile (narrowest caller dtype).
    out_ref:  (1, 1, 4, 8, 128) f32 accumulator resident across the innermost
              grid axis; rows hold lane/sublane partial sums of
              [q, target, q*target, (1-q)*(1-target)], q = 1 - softmax[class_id].
    """
    num_ch = pred_ref.shape[1]
    split = pl.program_id(1)
    n_idx = pl.program_id(2)
    tile = split * tiles_per_split + n_idx

    @pl.when(n_idx == 0)
    def _():
        out_ref[...] = jnp.zeros_like(out_ref)

    def fold(v):  # (chunk, 128) -> (8, 128): pure VPU adds
        return jnp.sum(v.reshape(chunk // _SUB, _SUB, _LANE), axis=0)

    def chunk_body(c, masked):
        start = c * chunk
        if not isinstance(start, int):
            start = pl.multiple_of(start, chunk)
        sl = pl.ds(start, chunk)

        # softmax prob of class_id without the max pass:
        #   p = 1 / (1 + sum_{j != cls} exp(x_j - x_cls))
        # exp overflow -> denom=inf -> p=0 -> q=1 (correct limit); the finite
        # clamp keeps the Newton refinement NaN-free in that limit.
        x_cls = pred_ref[0, class_id, sl, :].astype(jnp.float32)
        acc = None
        for j in range(num_ch):
            if j == class_id:
                continue
            e = jnp.exp(pred_ref[0, j, sl, :].astype(jnp.float32) - x_cls)
            acc = e if acc is None else acc + e
        if acc is None:  # degenerate C == 1
            denom = jnp.ones((chunk, _LANE), jnp.float32)
        else:
            denom = acc + 1.0
        denom = jnp.minimum(denom, jnp.float32(3.0e38))
        r = pl.reciprocal(denom, approx=True)      # EUP slot
        p_cls = r * (2.0 - denom * r)              # one Newton step: removes approx bias
        q = 1.0 - p_cls                            # reverse=True: p := 1 - p

        g = gt_ref[0, sl, :]
        t = g != class_id
        if check_ignore:                           # statically skipped when impossible
            t = jnp.logical_and(t, g != ignore_index)
        t = t.astype(jnp.float32)
        spec = p_cls * (1.0 - t)                   # (1 - q) * (1 - target)

        if masked:
            # Only the final tile contains padded positions.
            row = lax.broadcasted_iota(jnp.int32, (chunk, _LANE), 0)
            lane = lax.broadcasted_iota(jnp.int32, (chunk, _LANE), 1)
            pos = ((num_tiles - 1) * ts + c * chunk + row) * _LANE + lane
            valid = (pos < n_valid).astype(jnp.float32)
            q = q * valid
            t = t * valid
            spec = spec * valid

        out_ref[0, 0, 0] = out_ref[0, 0, 0] + fold(q)
        out_ref[0, 0, 1] = out_ref[0, 0, 1] + fold(t)
        out_ref[0, 0, 2] = out_ref[0, 0, 2] + fold(q * t)
        out_ref[0, 0, 3] = out_ref[0, 0, 3] + fold(spec)

    def accumulate(masked):
        nchunks = ts // chunk
        if nchunks == 1:
            chunk_body(0, masked)
        else:
            # Bounded f32 working set: process the tile in `chunk`-row pieces.
            def body(c, carry):
                chunk_body(c, masked)
                return carry
            lax.fori_loop(0, nchunks, body, 0, unroll=nchunks <= 4)

    if need_mask:
        @pl.when(tile < num_tiles - 1)
        def _():
            accumulate(False)

        @pl.when(tile == num_tiles - 1)
        def _():
            accumulate(True)
    else:
        @pl.when(tile < num_tiles)          # skips clamped duplicate tiles
        def _():
            accumulate(False)


def geo_scal_loss(pred, gt, *, num_classes, loss_weight=1.0, ignore_index=255):
    """JAX/Pallas equivalent of GeoScalLoss.forward(pred, gt).

    pred: (B, C, H, W) or (B, C, N) float logits (softmax over C inside).
    gt:   (B, H, W) or (B, N) integer labels (ignore_index excluded from target).
    """
    B, C = pred.shape[0], pred.shape[1]
    N = 1
    for d in pred.shape[2:]:
        N *= d
    class_id = num_classes - 1

    pred3 = pred.reshape(B, C, N)                    # native dtype pass-through (bf16 ok)
    gt2 = gt.reshape(B, N)
    if (not jnp.issubdtype(gt2.dtype, jnp.integer)) or jnp.dtype(gt2.dtype).itemsize > 4:
        gt2 = gt2.astype(jnp.int32)                  # only widen if we must (bool/int64/...)
    gt_dtype = gt2.dtype
    ii = jnp.iinfo(gt_dtype)
    check_ignore = (ii.min <= ignore_index <= ii.max)

    pred_isz = jnp.dtype(pred3.dtype).itemsize
    gt_isz = jnp.dtype(gt_dtype).itemsize
    row_mult = max(_SUB, 32 // pred_isz, 32 // gt_isz)   # sublane packing of narrowest dtype

    # Generation-aware VMEM budget for the double-buffered input blocks.
    phys_vmem = None
    try:
        phys_vmem = getattr(pltpu.get_tpu_info(), "vmem_capacity_bytes", None)
    except Exception:
        phys_vmem = None
    small_vmem = phys_vmem is not None and phys_vmem <= (80 << 20)   # v7x: 64 MiB
    in_budget = (12 << 20) if small_vmem else (20 << 20)

    row_bytes = C * _LANE * pred_isz + _LANE * gt_isz
    ts_cap = 1024
    ts_max = max(row_mult,
                 min(ts_cap, (in_budget // (2 * row_bytes)) // row_mult * row_mult))

    rows = -(-N // _LANE)
    ts, num_tiles = _pick_tile(rows, N, row_mult, ts_max)
    chunk = _pick_chunk(ts, row_mult)
    s_pad = num_tiles * ts
    pad_elems = s_pad * _LANE - N
    need_mask = pad_elems > 0

    if need_mask:
        # Only the lane/row remainder is padded (< one tile); zero pad for pred
        # (finite logits) and class_id for gt (target = 0 there).
        pred3 = jnp.pad(pred3, ((0, 0), (0, 0), (0, pad_elems)))
        gt2 = jnp.pad(gt2, ((0, 0), (0, pad_elems)), constant_values=class_id)

    pred4 = pred3.reshape(B, C, s_pad, _LANE)
    gt3 = gt2.reshape(B, s_pad, _LANE)

    # 2-way spatial split keeps both v7x TensorCores busy even at tiny B.
    nsplit = 2 if num_tiles >= 2 else 1
    tps = -(-num_tiles // nsplit)

    def tile_idx(s, n):
        t = s * tps + n
        return jnp.minimum(t, num_tiles - 1) if nsplit * tps > num_tiles else t

    kernel = functools.partial(
        _geo_scal_sums_kernel, class_id=class_id, ignore_index=ignore_index,
        check_ignore=check_ignore, n_valid=N, ts=ts, chunk=chunk,
        num_tiles=num_tiles, tiles_per_split=tps, need_mask=need_mask)

    pred_blk = C * ts * _LANE * pred_isz
    gt_blk = ts * _LANE * gt_isz
    vmem_limit = max(2 * (pred_blk + gt_blk) + (8 << 20), 32 << 20)
    if phys_vmem is not None:
        vmem_limit = min(vmem_limit, int(phys_vmem) - (8 << 20))
    else:
        vmem_limit = min(vmem_limit, 48 << 20)

    sums = pl.pallas_call(
        kernel,
        out_shape=jax.ShapeDtypeStruct((B, nsplit, 4, _SUB, _LANE), jnp.float32),
        grid_spec=pltpu.PrefetchScalarGridSpec(
            num_scalar_prefetch=0,
            grid=(B, nsplit, tps),
            in_specs=[
                pl.BlockSpec((1, C, ts, _LANE),
                             lambda b, s, n: (b, 0, tile_idx(s, n), 0)),
                pl.BlockSpec((1, ts, _LANE),
                             lambda b, s, n: (b, tile_idx(s, n), 0)),
            ],
            out_specs=pl.BlockSpec((1, 1, 4, _SUB, _LANE),
                                   lambda b, s, n: (b, s, 0, 0, 0)),
        ),
        compiler_params=pltpu.CompilerParams(
            dimension_semantics=("parallel", "parallel", "arbitrary"),
            vmem_limit_bytes=int(vmem_limit)),
    )(pred4, gt3)

    # Tiny epilogue: (B, NSPLIT, 4, 8, 128) -> (B, 4)
    s_all = jnp.sum(sums, axis=(1, 3, 4))
    s_p, s_t, s_nom, s_spec = s_all[:, 0], s_all[:, 1], s_all[:, 2], s_all[:, 3]
    n_f = jnp.float32(N)
    s_ct = n_f - s_t                                   # sum(1 - target)

    def bce_ones(x):
        # F.binary_cross_entropy(x, ones, reduction='none') == clamp(-log x, max=100)
        return jnp.minimum(-jnp.log(jnp.minimum(x, 1.0)), 100.0)

    mask = s_t > 0
    precision = s_nom / jnp.where(s_p > 0, s_p, 1.0)
    recall = s_nom / jnp.where(s_t > 0, s_t, 1.0)
    specificity = s_spec / jnp.where(s_ct > 0, s_ct, 1.0)

    loss_b = (jnp.where(s_p > 0, bce_ones(precision), 0.0)
              + jnp.where(s_t > 0, bce_ones(recall), 0.0)
              + jnp.where(s_ct > 0, bce_ones(specificity), 0.0))
    loss_b = jnp.where(mask, loss_b, 0.0)
    return jnp.float32(loss_weight) * jnp.mean(loss_b)


def _geo_scal_loss_ref(pred, gt, *, num_classes, loss_weight=1.0, ignore_index=255):
    """Pure-JAX reference replicating the PyTorch math (no Pallas)."""
    B, C = pred.shape[0], pred.shape[1]
    p_all = jax.nn.softmax(pred.reshape(B, C, -1).astype(jnp.float32), axis=1)
    class_id = num_classes - 1
    q = 1.0 - p_all[:, class_id, :]
    g = gt.reshape(B, -1)
    t = jnp.logical_and(g != class_id, g != ignore_index).astype(jnp.float32)

    s_p, s_t = jnp.sum(q, axis=1), jnp.sum(t, axis=1)
    s_nom = jnp.sum(q * t, axis=1)
    s_spec = jnp.sum((1.0 - q) * (1.0 - t), axis=1)
    s_ct = jnp.float32(q.shape[1]) - s_t

    bce = lambda x: jnp.minimum(-jnp.log(jnp.minimum(x, 1.0)), 100.0)
    mask = s_t > 0
    loss_b = (jnp.where(s_p > 0, bce(s_nom / jnp.where(s_p > 0, s_p, 1.0)), 0.0)
              + jnp.where(s_t > 0, bce(s_nom / jnp.where(s_t > 0, s_t, 1.0)), 0.0)
              + jnp.where(s_ct > 0, bce(s_spec / jnp.where(s_ct > 0, s_ct, 1.0)), 0.0))
    loss_b = jnp.where(mask, loss_b, 0.0)
    return jnp.float32(loss_weight) * jnp.mean(loss_b)


if __name__ == "__main__":
    # GeoScalLoss(num_classes=4, loss_weight=1.0); small deterministic inputs.
    num_classes = 4
    loss_weight = 1.0
    B, C, H, W = 2, num_classes, 16, 16

    key = jax.random.PRNGKey(0)
    k_pred, k_gt, k_ign = jax.random.split(key, 3)

    pred = jax.random.normal(k_pred, (B, C, H, W), dtype=jnp.float32)
    gt = jax.random.randint(k_gt, (B, H, W), 0, num_classes, dtype=jnp.int32)
    # sprinkle in some ignore_index (255) labels
    ign = jax.random.uniform(k_ign, (B, H, W)) < 0.1
    gt = jnp.where(ign, jnp.int32(255), gt)

    loss = geo_scal_loss(pred, gt, num_classes=num_classes, loss_weight=loss_weight)
    loss = jax.block_until_ready(loss)

    ref = _geo_scal_loss_ref(pred, gt, num_classes=num_classes, loss_weight=loss_weight)
    ref = jax.block_until_ready(ref)

    assert jnp.isfinite(loss), f"non-finite loss: {loss}"
    tol = 2e-3 * max(1.0, abs(float(ref)))
    assert abs(float(loss) - float(ref)) < tol, f"mismatch: {loss} vs {ref}"

    print("KERNEL_OK")
</pallas_src>

<mosaic_0001>
module attributes {stable_mosaic.version = 11 : i64} {
  func.func @_geo_scal_sums_kernel(%arg0: i32, %arg1: i32, %arg2: i32, %arg3: memref<1x4x8x128xf32, #tpu.memory_space<vmem>>, %arg4: memref<1x8x128xi32, #tpu.memory_space<vmem>>, %arg5: memref<1x1x4x8x128xf32, #tpu.memory_space<vmem>>) attributes {dimension_semantics = [#tpu.dimension_semantics<parallel>, #tpu.dimension_semantics<parallel>, #tpu.dimension_semantics<arbitrary>], iteration_bounds = array<i64: 2, 1, 1>, scalar_prefetch = 0 : i64, scratch_operands = 0 : i64, tpu.core_type = #tpu.core_type<tc>, window_params = [{transform_indices = @transform_0, window_bounds = array<i64: 1, 4, 8, 128>}, {transform_indices = @transform_1, window_bounds = array<i64: 1, 8, 128>}, {transform_indices = @transform_2, window_bounds = array<i64: 1, 1, 4, 8, 128>}]} {
    %c1_i32 = arith.constant 1 : i32
    %0 = arith.muli %arg1, %c1_i32 : i32
    %1 = arith.addi %0, %arg2 : i32
    %c0_i32 = arith.constant 0 : i32
    %2 = arith.cmpi eq, %arg2, %c0_i32 : i32
    %3 = arith.extui %2 : i1 to i32
    %c0_i32_0 = arith.constant 0 : i32
    %4 = arith.cmpi ne, %3, %c0_i32_0 : i32
    scf.if %4 {
      %cst = arith.constant 0.000000e+00 : f32
      %11 = vector.broadcast %cst : f32 to vector<1x1x4x8x128xf32>
      %c0 = arith.constant 0 : index
      %c0_5 = arith.constant 0 : index
      %c0_6 = arith.constant 0 : index
      %c0_7 = arith.constant 0 : index
      %c0_8 = arith.constant 0 : index
      %12 = vector.load %arg5[%c0, %c0_5, %c0_6, %c0_7, %c0_8] : memref<1x1x4x8x128xf32, #tpu.memory_space<vmem>>, vector<1x1x4x8x128xf32>
      tpu.vector_store %arg5[%c0, %c0_5, %c0_6, %c0_7, %c0_8], %11 {strides = array<i32>} : memref<1x1x4x8x128xf32, #tpu.memory_space<vmem>>, vector<1x1x4x8x128xf32>,
    } else {
    }
    %c0_i32_1 = arith.constant 0 : i32
    %5 = arith.cmpi slt, %1, %c0_i32_1 : i32
    %6 = arith.extui %5 : i1 to i32
    %c0_i32_2 = arith.constant 0 : i32
    %7 = arith.cmpi ne, %6, %c0_i32_2 : i32
    scf.if %7 {
      %c0 = arith.constant 0 : index
      %c3 = arith.constant 3 : index
      %c0_5 = arith.constant 0 : index
      %c0_6 = arith.constant 0 : index
      %11 = vector.load %arg3[%c0, %c3, %c0_5, %c0_6] : memref<1x4x8x128xf32, #tpu.memory_space<vmem>>, vector<1x1x8x128xf32>
      %12 = vector.shape_cast %11 : vector<1x1x8x128xf32> to vector<8x128xf32>
      %c0_7 = arith.constant 0 : index
      %c0_8 = arith.constant 0 : index
      %c0_9 = arith.constant 0 : index
      %c0_10 = arith.constant 0 : index
      %13 = vector.load %arg3[%c0_7, %c0_8, %c0_9, %c0_10] : memref<1x4x8x128xf32, #tpu.memory_space<vmem>>, vector<1x1x8x128xf32>
      %14 = vector.shape_cast %13 : vector<1x1x8x128xf32> to vector<8x128xf32>
      %15 = arith.subf %14, %12 : vector<8x128xf32>
      %16 = math.exp %15 : vector<8x128xf32>
      %c0_11 = arith.constant 0 : index
      %c1 = arith.constant 1 : index
      %c0_12 = arith.constant 0 : index
      %c0_13 = arith.constant 0 : index
      %17 = vector.load %arg3[%c0_11, %c1, %c0_12, %c0_13] : memref<1x4x8x128xf32, #tpu.memory_space<vmem>>, vector<1x1x8x128xf32>
      %18 = vector.shape_cast %17 : vector<1x1x8x128xf32> to vector<8x128xf32>
      %19 = arith.subf %18, %12 : vector<8x128xf32>
      %20 = math.exp %19 : vector<8x128xf32>
      %21 = arith.addf %16, %20 : vector<8x128xf32>
      %c0_14 = arith.constant 0 : index
      %c2 = arith.constant 2 : index
      %c0_15 = arith.constant 0 : index
      %c0_16 = arith.constant 0 : index
      %22 = vector.load %arg3[%c0_14, %c2, %c0_15, %c0_16] : memref<1x4x8x128xf32, #tpu.memory_space<vmem>>, vector<1x1x8x128xf32>
      %23 = vector.shape_cast %22 : vector<1x1x8x128xf32> to vector<8x128xf32>
      %24 = arith.subf %23, %12 : vector<8x128xf32>
      %25 = math.exp %24 : vector<8x128xf32>
      %26 = arith.addf %21, %25 : vector<8x128xf32>
      %cst = arith.constant 1.000000e+00 : f32
      %27 = vector.broadcast %cst : f32 to vector<8x128xf32>
      %28 = arith.addf %26, %27 : vector<8x128xf32>
      %cst_17 = arith.constant 3.000000e+38 : f32
      %29 = vector.broadcast %cst_17 : f32 to vector<8x128xf32>
      %30 = arith.minimumf %28, %29 : vector<8x128xf32>
      %31 = tpu.reciprocal %30 {approx = true} : vector<8x128xf32> -> vector<8x128xf32>
      %32 = arith.mulf %30, %31 : vector<8x128xf32>
      %cst_18 = arith.constant 2.000000e+00 : f32
      %33 = vector.broadcast %cst_18 : f32 to vector<8x128xf32>
      %34 = arith.subf %33, %32 : vector<8x128xf32>
      %35 = arith.mulf %31, %34 : vector<8x128xf32>
      %cst_19 = arith.constant 1.000000e+00 : f32
      %36 = vector.broadcast %cst_19 : f32 to vector<8x128xf32>
      %37 = arith.subf %36, %35 : vector<8x128xf32>
      %c0_20 = arith.constant 0 : index
      %c0_21 = arith.constant 0 : index
      %c0_22 = arith.constant 0 : index
      %38 = vector.load %arg4[%c0_20, %c0_21, %c0_22] : memref<1x8x128xi32, #tpu.memory_space<vmem>>, vector<1x8x128xi32>
      %39 = vector.shape_cast %38 : vector<1x8x128xi32> to vector<8x128xi32>
      %c3_i32 = arith.constant 3 : i32
      %40 = vector.broadcast %c3_i32 : i32 to vector<8x128xi32>
      %41 = arith.cmpi ne, %39, %40 : vector<8x128xi32>
      %c255_i32 = arith.constant 255 : i32
      %42 = vector.broadcast %c255_i32 : i32 to vector<8x128xi32>
      %43 = arith.cmpi ne, %39, %42 : vector<8x128xi32>
      %44 = arith.andi %41, %43 : vector<8x128xi1>
      %45 = arith.extui %44 : vector<8x128xi1> to vector<8x128xi32>
      %46 = arith.sitofp %45 : vector<8x128xi32> to vector<8x128xf32>
      %cst_23 = arith.constant 1.000000e+00 : f32
      %47 = vector.broadcast %cst_23 : f32 to vector<8x128xf32>
      %48 = arith.subf %47, %46 : vector<8x128xf32>
      %49 = arith.mulf %35, %48 : vector<8x128xf32>
      %c0_24 = arith.constant 0 : index
      %c0_25 = arith.constant 0 : index
      %c0_26 = arith.constant 0 : index
      %c0_27 = arith.constant 0 : index
      %c0_28 = arith.constant 0 : index
      %50 = vector.load %arg5[%c0_24, %c0_25, %c0_26, %c0_27, %c0_28] : memref<1x1x4x8x128xf32, #tpu.memory_space<vmem>>, vector<1x1x1x8x128xf32>
      %51 = vector.shape_cast %50 : vector<1x1x1x8x128xf32> to vector<8x128xf32>
      %52 = vector.shape_cast %37 : vector<8x128xf32> to vector<1x8x128xf32>
      %cst_29 = arith.constant dense<0.000000e+00> : vector<8x128xf32>
      %53 = vector.multi_reduction <add>, %52, %cst_29 [0] : vector<1x8x128xf32> to vector<8x128xf32>
      %54 = arith.addf %51, %53 : vector<8x128xf32>
      %c0_30 = arith.constant 0 : index
      %c0_31 = arith.constant 0 : index
      %c0_32 = arith.constant 0 : index
      %c0_33 = arith.constant 0 : index
      %c0_34 = arith.constant 0 : index
      %55 = vector.load %arg5[%c0_30, %c0_31, %c0_32, %c0_33, %c0_34] : memref<1x1x4x8x128xf32, #tpu.memory_space<vmem>>, vector<1x1x1x8x128xf32>
      %56 = vector.shape_cast %55 : vector<1x1x1x8x128xf32> to vector<8x128xf32>
      %57 = vector.shape_cast %54 : vector<8x128xf32> to vector<1x1x1x8x128xf32>
      tpu.vector_store %arg5[%c0_30, %c0_31, %c0_32, %c0_33, %c0_34], %57 {strides = array<i32>} : memref<1x1x4x8x128xf32, #tpu.memory_space<vmem>>, vector<1x1x1x8x128xf32>,
      %c0_35 = arith.constant 0 : index
      %c0_36 = arith.constant 0 : index
      %c1_37 = arith.constant 1 : index
      %c0_38 = arith.constant 0 : index
      %c0_39 = arith.constant 0 : index
      %58 = vector.load %arg5[%c0_35, %c0_36, %c1_37, %c0_38, %c0_39] : memref<1x1x4x8x128xf32, #tpu.memory_space<vmem>>, vector<1x1x1x8x128xf32>
      %59 = vector.shape_cast %58 : vector<1x1x1x8x128xf32> to vector<8x128xf32>
      %60 = vector.shape_cast %46 : vector<8x128xf32> to vector<1x8x128xf32>
      %cst_40 = arith.constant dense<0.000000e+00> : vector<8x128xf32>
      %61 = vector.multi_reduction <add>, %60, %cst_40 [0] : vector<1x8x128xf32> to vector<8x128xf32>
      %62 = arith.addf %59, %61 : vector<8x128xf32>
      %c0_41 = arith.constant 0 : index
      %c0_42 = arith.constant 0 : index
      %c1_43 = arith.constant 1 : index
      %c0_44 = arith.constant 0 : index
      %c0_45 = arith.constant 0 : index
      %63 = vector.load %arg5[%c0_41, %c0_42, %c1_43, %c0_44, %c0_45] : memref<1x1x4x8x128xf32, #tpu.memory_space<vmem>>, vector<1x1x1x8x128xf32>
      %64 = vector.shape_cast %63 : vector<1x1x1x8x128xf32> to vector<8x128xf32>
      %65 = vector.shape_cast %62 : vector<8x128xf32> to vector<1x1x1x8x128xf32>
      tpu.vector_store %arg5[%c0_41, %c0_42, %c1_43, %c0_44, %c0_45], %65 {strides = array<i32>} : memref<1x1x4x8x128xf32, #tpu.memory_space<vmem>>, vector<1x1x1x8x128xf32>,
      %c0_46 = arith.constant 0 : index
      %c0_47 = arith.constant 0 : index
      %c2_48 = arith.constant 2 : index
      %c0_49 = arith.constant 0 : index
      %c0_50 = arith.constant 0 : index
      %66 = vector.load %arg5[%c0_46, %c0_47, %c2_48, %c0_49, %c0_50] : memref<1x1x4x8x128xf32, #tpu.memory_space<vmem>>, vector<1x1x1x8x128xf32>
      %67 = vector.shape_cast %66 : vector<1x1x1x8x128xf32> to vector<8x128xf32>
      %68 = arith.mulf %37, %46 : vector<8x128xf32>
      %69 = vector.shape_cast %68 : vector<8x128xf32> to vector<1x8x128xf32>
      %cst_51 = arith.constant dense<0.000000e+00> : vector<8x128xf32>
      %70 = vector.multi_reduction <add>, %69, %cst_51 [0] : vector<1x8x128xf32> to vector<8x128xf32>
      %71 = arith.addf %67, %70 : vector<8x128xf32>
      %c0_52 = arith.constant 0 : index
      %c0_53 = arith.constant 0 : index
      %c2_54 = arith.constant 2 : index
      %c0_55 = arith.constant 0 : index
      %c0_56 = arith.constant 0 : index
      %72 = vector.load %arg5[%c0_52, %c0_53, %c2_54, %c0_55, %c0_56] : memref<1x1x4x8x128xf32, #tpu.memory_space<vmem>>, vector<1x1x1x8x128xf32>
      %73 = vector.shape_cast %72 : vector<1x1x1x8x128xf32> to vector<8x128xf32>
      %74 = vector.shape_cast %71 : vector<8x128xf32> to vector<1x1x1x8x128xf32>
      tpu.vector_store %arg5[%c0_52, %c0_53, %c2_54, %c0_55, %c0_56], %74 {strides = array<i32>} : memref<1x1x4x8x128xf32, #tpu.memory_space<vmem>>, vector<1x1x1x8x128xf32>,
      %c0_57 = arith.constant 0 : index
      %c0_58 = arith.constant 0 : index
      %c3_59 = arith.constant 3 : index
      %c0_60 = arith.constant 0 : index
      %c0_61 = arith.constant 0 : index
      %75 = vector.load %arg5[%c0_57, %c0_58, %c3_59, %c0_60, %c0_61] : memref<1x1x4x8x128xf32, #tpu.memory_space<vmem>>, vector<1x1x1x8x128xf32>
      %76 = vector.shape_cast %75 : vector<1x1x1x8x128xf32> to vector<8x128xf32>
      %77 = vector.shape_cast %49 : vector<8x128xf32> to vector<1x8x128xf32>
      %cst_62 = arith.constant dense<0.000000e+00> : vector<8x128xf32>
      %78 = vector.multi_reduction <add>, %77, %cst_62 [0] : vector<1x8x128xf32> to vector<8x128xf32>
      %79 = arith.addf %76, %78 : vector<8x128xf32>
      %c0_63 = arith.constant 0 : index
      %c0_64 = arith.constant 0 : index
      %c3_65 = arith.constant 3 : index
      %c0_66 = arith.constant 0 : index
      %c0_67 = arith.constant 0 : index
      %80 = vector.load %arg5[%c0_63, %c0_64, %c3_65, %c0_66, %c0_67] : memref<1x1x4x8x128xf32, #tpu.memory_space<vmem>>, vector<1x1x1x8x128xf32>
      %81 = vector.shape_cast %80 : vector<1x1x1x8x128xf32> to vector<8x128xf32>
      %82 = vector.shape_cast %79 : vector<8x128xf32> to vector<1x1x1x8x128xf32>
      tpu.vector_store %arg5[%c0_63, %c0_64, %c3_65, %c0_66, %c0_67], %82 {strides = array<i32>} : memref<1x1x4x8x128xf32, #tpu.memory_space<vmem>>, vector<1x1x1x8x128xf32>,
    } else {
    }
    %c0_i32_3 = arith.constant 0 : i32
    %8 = arith.cmpi eq, %1, %c0_i32_3 : i32
    %9 = arith.extui %8 : i1 to i32
    %c0_i32_4 = arith.constant 0 : i32
    %10 = arith.cmpi ne, %9, %c0_i32_4 : i32
    scf.if %10 {
      %c0 = arith.constant 0 : index
      %c3 = arith.constant 3 : index
      %c0_5 = arith.constant 0 : index
      %c0_6 = arith.constant 0 : index
      %11 = vector.load %arg3[%c0, %c3, %c0_5, %c0_6] : memref<1x4x8x128xf32, #tpu.memory_space<vmem>>, vector<1x1x8x128xf32>
      %12 = vector.shape_cast %11 : vector<1x1x8x128xf32> to vector<8x128xf32>
      %c0_7 = arith.constant 0 : index
      %c0_8 = arith.constant 0 : index
      %c0_9 = arith.constant 0 : index
      %c0_10 = arith.constant 0 : index
      %13 = vector.load %arg3[%c0_7, %c0_8, %c0_9, %c0_10] : memref<1x4x8x128xf32, #tpu.memory_space<vmem>>, vector<1x1x8x128xf32>
      %14 = vector.shape_cast %13 : vector<1x1x8x128xf32> to vector<8x128xf32>
      %15 = arith.subf %14, %12 : vector<8x128xf32>
      %16 = math.exp %15 : vector<8x128xf32>
      %c0_11 = arith.constant 0 : index
      %c1 = arith.constant 1 : index
      %c0_12 = arith.constant 0 : index
      %c0_13 = arith.constant 0 : index
      %17 = vector.load %arg3[%c0_11, %c1, %c0_12, %c0_13] : memref<1x4x8x128xf32, #tpu.memory_space<vmem>>, vector<1x1x8x128xf32>
      %18 = vector.shape_cast %17 : vector<1x1x8x128xf32> to vector<8x128xf32>
      %19 = arith.subf %18, %12 : vector<8x128xf32>
      %20 = math.exp %19 : vector<8x128xf32>
      %21 = arith.addf %16, %20 : vector<8x128xf32>
      %c0_14 = arith.constant 0 : index
      %c2 = arith.constant 2 : index
      %c0_15 = arith.constant 0 : index
      %c0_16 = arith.constant 0 : index
      %22 = vector.load %arg3[%c0_14, %c2, %c0_15, %c0_16] : memref<1x4x8x128xf32, #tpu.memory_space<vmem>>, vector<1x1x8x128xf32>
      %23 = vector.shape_cast %22 : vector<1x1x8x128xf32> to vector<8x128xf32>
      %24 = arith.subf %23, %12 : vector<8x128xf32>
      %25 = math.exp %24 : vector<8x128xf32>
      %26 = arith.addf %21, %25 : vector<8x128xf32>
      %cst = arith.constant 1.000000e+00 : f32
      %27 = vector.broadcast %cst : f32 to vector<8x128xf32>
      %28 = arith.addf %26, %27 : vector<8x128xf32>
      %cst_17 = arith.constant 3.000000e+38 : f32
      %29 = vector.broadcast %cst_17 : f32 to vector<8x128xf32>
      %30 = arith.minimumf %28, %29 : vector<8x128xf32>
      %31 = tpu.reciprocal %30 {approx = true} : vector<8x128xf32> -> vector<8x128xf32>
      %32 = arith.mulf %30, %31 : vector<8x128xf32>
      %cst_18 = arith.constant 2.000000e+00 : f32
      %33 = vector.broadcast %cst_18 : f32 to vector<8x128xf32>
      %34 = arith.subf %33, %32 : vector<8x128xf32>
      %35 = arith.mulf %31, %34 : vector<8x128xf32>
      %cst_19 = arith.constant 1.000000e+00 : f32
      %36 = vector.broadcast %cst_19 : f32 to vector<8x128xf32>
      %37 = arith.subf %36, %35 : vector<8x128xf32>
      %c0_20 = arith.constant 0 : index
      %c0_21 = arith.constant 0 : index
      %c0_22 = arith.constant 0 : index
      %38 = vector.load %arg4[%c0_20, %c0_21, %c0_22] : memref<1x8x128xi32, #tpu.memory_space<vmem>>, vector<1x8x128xi32>
      %39 = vector.shape_cast %38 : vector<1x8x128xi32> to vector<8x128xi32>
      %c3_i32 = arith.constant 3 : i32
      %40 = vector.broadcast %c3_i32 : i32 to vector<8x128xi32>
      %41 = arith.cmpi ne, %39, %40 : vector<8x128xi32>
      %c255_i32 = arith.constant 255 : i32
      %42 = vector.broadcast %c255_i32 : i32 to vector<8x128xi32>
      %43 = arith.cmpi ne, %39, %42 : vector<8x128xi32>
      %44 = arith.andi %41, %43 : vector<8x128xi1>
      %45 = arith.extui %44 : vector<8x128xi1> to vector<8x128xi32>
      %46 = arith.sitofp %45 : vector<8x128xi32> to vector<8x128xf32>
      %cst_23 = arith.constant 1.000000e+00 : f32
      %47 = vector.broadcast %cst_23 : f32 to vector<8x128xf32>
      %48 = arith.subf %47, %46 : vector<8x128xf32>
      %49 = arith.mulf %35, %48 : vector<8x128xf32>
      %50 = tpu.iota {dimensions = array<i32: 0>} : vector<8x128xi32>
      %51 = tpu.iota {dimensions = array<i32: 1>} : vector<8x128xi32>
      %c0_i32_24 = arith.constant 0 : i32
      %52 = vector.broadcast %c0_i32_24 : i32 to vector<8x128xi32>
      %53 = arith.addi %52, %50 : vector<8x128xi32>
      %c128_i32 = arith.constant 128 : i32
      %54 = vector.broadcast %c128_i32 : i32 to vector<8x128xi32>
      %55 = arith.muli %53, %54 : vector<8x128xi32>
      %56 = arith.addi %55, %51 : vector<8x128xi32>
      %c256_i32 = arith.constant 256 : i32
      %57 = vector.broadcast %c256_i32 : i32 to vector<8x128xi32>
      %58 = arith.cmpi slt, %56, %57 : vector<8x128xi32>
      %59 = arith.extui %58 : vector<8x128xi1> to vector<8x128xi32>
      %60 = arith.sitofp %59 : vector<8x128xi32> to vector<8x128xf32>
      %61 = arith.mulf %37, %60 : vector<8x128xf32>
      %62 = arith.mulf %46, %60 : vector<8x128xf32>
      %63 = arith.mulf %49, %60 : vector<8x128xf32>
      %c0_25 = arith.constant 0 : index
      %c0_26 = arith.constant 0 : index
      %c0_27 = arith.constant 0 : index
      %c0_28 = arith.constant 0 : index
      %c0_29 = arith.constant 0 : index
      %64 = vector.load %arg5[%c0_25, %c0_26, %c0_27, %c0_28, %c0_29] : memref<1x1x4x8x128xf32, #tpu.memory_space<vmem>>, vector<1x1x1x8x128xf32>
      %65 = vector.shape_cast %64 : vector<1x1x1x8x128xf32> to vector<8x128xf32>
      %66 = vector.shape_cast %61 : vector<8x128xf32> to vector<1x8x128xf32>
      %cst_30 = arith.constant dense<0.000000e+00> : vector<8x128xf32>
      %67 = vector.multi_reduction <add>, %66, %cst_30 [0] : vector<1x8x128xf32> to vector<8x128xf32>
      %68 = arith.addf %65, %67 : vector<8x128xf32>
      %c0_31 = arith.constant 0 : index
      %c0_32 = arith.constant 0 : index
      %c0_33 = arith.constant 0 : index
      %c0_34 = arith.constant 0 : index
      %c0_35 = arith.constant 0 : index
      %69 = vector.load %arg5[%c0_31, %c0_32, %c0_33, %c0_34, %c0_35] : memref<1x1x4x8x128xf32, #tpu.memory_space<vmem>>, vector<1x1x1x8x128xf32>
      %70 = vector.shape_cast %69 : vector<1x1x1x8x128xf32> to vector<8x128xf32>
      %71 = vector.shape_cast %68 : vector<8x128xf32> to vector<1x1x1x8x128xf32>
      tpu.vector_store %arg5[%c0_31, %c0_32, %c0_33, %c0_34, %c0_35], %71 {strides = array<i32>} : memref<1x1x4x8x128xf32, #tpu.memory_space<vmem>>, vector<1x1x1x8x128xf32>,
      %c0_36 = arith.constant 0 : index
      %c0_37 = arith.constant 0 : index
      %c1_38 = arith.constant 1 : index
      %c0_39 = arith.constant 0 : index
      %c0_40 = arith.constant 0 : index
      %72 = vector.load %arg5[%c0_36, %c0_37, %c1_38, %c0_39, %c0_40] : memref<1x1x4x8x128xf32, #tpu.memory_space<vmem>>, vector<1x1x1x8x128xf32>
      %73 = vector.shape_cast %72 : vector<1x1x1x8x128xf32> to vector<8x128xf32>
      %74 = vector.shape_cast %62 : vector<8x128xf32> to vector<1x8x128xf32>
      %cst_41 = arith.constant dense<0.000000e+00> : vector<8x128xf32>
      %75 = vector.multi_reduction <add>, %74, %cst_41 [0] : vector<1x8x128xf32> to vector<8x128xf32>
      %76 = arith.addf %73, %75 : vector<8x128xf32>
      %c0_42 = arith.constant 0 : index
      %c0_43 = arith.constant 0 : index
      %c1_44 = arith.constant 1 : index
      %c0_45 = arith.constant 0 : index
      %c0_46 = arith.constant 0 : index
      %77 = vector.load %arg5[%c0_42, %c0_43, %c1_44, %c0_45, %c0_46] : memref<1x1x4x8x128xf32, #tpu.memory_space<vmem>>, vector<1x1x1x8x128xf32>
      %78 = vector.shape_cast %77 : vector<1x1x1x8x128xf32> to vector<8x128xf32>
      %79 = vector.shape_cast %76 : vector<8x128xf32> to vector<1x1x1x8x128xf32>
      tpu.vector_store %arg5[%c0_42, %c0_43, %c1_44, %c0_45, %c0_46], %79 {strides = array<i32>} : memref<1x1x4x8x128xf32, #tpu.memory_space<vmem>>, vector<1x1x1x8x128xf32>,
      %c0_47 = arith.constant 0 : index
      %c0_48 = arith.constant 0 : index
      %c2_49 = arith.constant 2 : index
      %c0_50 = arith.constant 0 : index
      %c0_51 = arith.constant 0 : index
      %80 = vector.load %arg5[%c0_47, %c0_48, %c2_49, %c0_50, %c0_51] : memref<1x1x4x8x128xf32, #tpu.memory_space<vmem>>, vector<1x1x1x8x128xf32>
      %81 = vector.shape_cast %80 : vector<1x1x1x8x128xf32> to vector<8x128xf32>
      %82 = arith.mulf %61, %62 : vector<8x128xf32>
      %83 = vector.shape_cast %82 : vector<8x128xf32> to vector<1x8x128xf32>
      %cst_52 = arith.constant dense<0.000000e+00> : vector<8x128xf32>
      %84 = vector.multi_reduction <add>, %83, %cst_52 [0] : vector<1x8x128xf32> to vector<8x128xf32>
      %85 = arith.addf %81, %84 : vector<8x128xf32>
      %c0_53 = arith.constant 0 : index
      %c0_54 = arith.constant 0 : index
      %c2_55 = arith.constant 2 : index
      %c0_56 = arith.constant 0 : index
      %c0_57 = arith.constant 0 : index
      %86 = vector.load %arg5[%c0_53, %c0_54, %c2_55, %c0_56, %c0_57] : memref<1x1x4x8x128xf32, #tpu.memory_space<vmem>>, vector<1x1x1x8x128xf32>
      %87 = vector.shape_cast %86 : vector<1x1x1x8x128xf32> to vector<8x128xf32>
      %88 = vector.shape_cast %85 : vector<8x128xf32> to vector<1x1x1x8x128xf32>
      tpu.vector_store %arg5[%c0_53, %c0_54, %c2_55, %c0_56, %c0_57], %88 {strides = array<i32>} : memref<1x1x4x8x128xf32, #tpu.memory_space<vmem>>, vector<1x1x1x8x128xf32>,
      %c0_58 = arith.constant 0 : index
      %c0_59 = arith.constant 0 : index
      %c3_60 = arith.constant 3 : index
      %c0_61 = arith.constant 0 : index
      %c0_62 = arith.constant 0 : index
      %89 = vector.load %arg5[%c0_58, %c0_59, %c3_60, %c0_61, %c0_62] : memref<1x1x4x8x128xf32, #tpu.memory_space<vmem>>, vector<1x1x1x8x128xf32>
      %90 = vector.shape_cast %89 : vector<1x1x1x8x128xf32> to vector<8x128xf32>
      %91 = vector.shape_cast %63 : vector<8x128xf32> to vector<1x8x128xf32>
      %cst_63 = arith.constant dense<0.000000e+00> : vector<8x128xf32>
      %92 = vector.multi_reduction <add>, %91, %cst_63 [0] : vector<1x8x128xf32> to vector<8x128xf32>
      %93 = arith.addf %90, %92 : vector<8x128xf32>
      %c0_64 = arith.constant 0 : index
      %c0_65 = arith.constant 0 : index
      %c3_66 = arith.constant 3 : index
      %c0_67 = arith.constant 0 : index
      %c0_68 = arith.constant 0 : index
      %94 = vector.load %arg5[%c0_64, %c0_65, %c3_66, %c0_67, %c0_68] : memref<1x1x4x8x128xf32, #tpu.memory_space<vmem>>, vector<1x1x1x8x128xf32>
      %95 = vector.shape_cast %94 : vector<1x1x1x8x128xf32> to vector<8x128xf32>
      %96 = vector.shape_cast %93 : vector<8x128xf32> to vector<1x1x1x8x128xf32>
      tpu.vector_store %arg5[%c0_64, %c0_65, %c3_66, %c0_67, %c0_68], %96 {strides = array<i32>} : memref<1x1x4x8x128xf32, #tpu.memory_space<vmem>>, vector<1x1x1x8x128xf32>,
    } else {
    }
    return
  }
  func.func @transform_0(%arg0: i32, %arg1: i32, %arg2: i32) -> (i32, i32, i32, i32) {
    %c1_i32 = arith.constant 1 : i32
    %0 = arith.muli %arg1, %c1_i32 : i32
    %1 = arith.addi %0, %arg2 : i32
    %c0_i32 = arith.constant 0 : i32
    %c0_i32_0 = arith.constant 0 : i32
    %c0_i32_1 = arith.constant 0 : i32
    return %arg0, %c0_i32, %1, %c0_i32_0 : i32, i32, i32, i32
  }
  func.func @transform_1(%arg0: i32, %arg1: i32, %arg2: i32) -> (i32, i32, i32) {
    %c1_i32 = arith.constant 1 : i32
    %0 = arith.muli %arg1, %c1_i32 : i32
    %1 = arith.addi %0, %arg2 : i32
    %c0_i32 = arith.constant 0 : i32
    %c0_i32_0 = arith.constant 0 : i32
    return %arg0, %1, %c0_i32 : i32, i32, i32
  }
  func.func @transform_2(%arg0: i32, %arg1: i32, %arg2: i32) -> (i32, i32, i32, i32, i32) {
    %c0_i32 = arith.constant 0 : i32
    %c0_i32_0 = arith.constant 0 : i32
    %c0_i32_1 = arith.constant 0 : i32
    %c0_i32_2 = arith.constant 0 : i32
    return %arg0, %arg1, %c0_i32, %c0_i32_0, %c0_i32_1 : i32, i32, i32, i32, i32
  }
}

</mosaic_0001>

<bundles_post_ra>
// kernel: tpu_custom_call.1
= control target key start
LH: loop header
LB: loop body
LE: loop exit
PB: predicated region body
PF: predicated region fallthrough
CT: control target
= control target key end

     0   :  { %7 = vsyncpa [#allocation3], 0  ;;  %s1013_s0 = inlined_call_operand.hbm [shape: f32[2,4,8,128], index: 0, kind: input, shape index: {}]   ;;  %s1014_s1 = inlined_call_operand.hbm [shape: s32[2,8,128], index: 1, kind: input, shape index: {}]   ;;  %s1015_s2 = inlined_call_operand.hbm [shape: f32[2,1,4,8,128], index: 2, kind: output, shape index: {}]  }
   0x1   :  { %9 = vsyncpa [#allocation3 + $0x1], 0 }
   0x2   :  { %10 = vsyncpa [#allocation6], 0 }
   0x3   :  { %12 = vsyncpa [#allocation6 + $0x1], 0 }
   0x4   :  { %13 = vsyncpa [#allocation4], 0 }
   0x5   :  { %15 = vsyncpa [#allocation4 + $0x1], 0  ;;  %s792_s9 = smov 0   ;;  %s794_s10 = smov 0  }
   0x6   :  { %s796_s11 = smov 0   ;;  %s798_s12 = smov 0  }
   0x7   :  { %s800_s13 = smov 0   ;;  %s802_s14 = smov 0  }
   0x8 LB: > { %s500_s15 = sadd.s32 4294967295, %s767_s14   ;;  %s501_s16 = sadd.s32 4294967294, %s767_s14   ;;  %s767_s14 = sphi %s802_s14, %s21_s14   ;;  %s763_s13 = sphi %s800_s13, %s1034_s13   ;;  %s759_s12 = sphi %s798_s12, %s1033_s12   ;;  %s755_s11 = sphi %s796_s11, %s1032_s11   ;;  %s751_s10 = sphi %s794_s10, %s1031_s10   ;;  %s747_s9 = sphi %s792_s9, %s1030_s9  }
   0x9   : > { %s40_s17 = sadd.s32 1, %s763_s13  ;;  %s51_s18 = sadd.s32 1, %s755_s11 }
   0xa   : > { %p42_p0 = scmp.ge.s32.totalorder %s40_s17, 2  ;;  %p58_p1 = scmp.ne.s32.totalorder %s755_s11, %s751_s10 }
   0xb   : > { %p59_p2 = scmp.eq.s32.totalorder %s767_s14, 0  ;;  %p64_p3 = scmp.ne.s32.totalorder %s751_s10, %s747_s9 }
   0xc   : > { %s1036_s17 = smov (%p42_p0, %s40_s17), 0  ;;  %p65_p5 = scmp.eq.s32.totalorder %s500_s15, 0 }
   0xd   : > { %p833_p4 = por %p59_p2, %p58_p1  ;;  %s46_s20 = ssub.s32 %s763_s13, %s1036_s17 }
   0xe   : > { %p120_p6 = scmp.eq.s32.totalorder %s500_s15, 1  ;;  %p49_p7 = scmp.eq.s32.totalorder %s46_s20, 0 }
   0xf   : > { %p839_p8 = por %p65_p5, %p64_p3  ;;  %p126_p10 = scmp.eq.s32.totalorder %s501_s16, 1 }
  0x10   : > { %p843_p9 = por %p120_p6, %p58_p1  ;;  %p558_p13 = scmp.lt.s32.totalorder %s767_s14, 2 }
  0x11   : > { %s1019_s21 = scalar_select %p839_p8, 1, 0 }
  0x12   : > { %s1020_s22 = scalar_select %p843_p9, 1, 0 }
  0x13   : > { %s848_s23 = scalar_select %p49_p7, %s755_s11, %s51_s18  }
  0x14   : > { %p850_p11 = por %p126_p10, %p64_p3  ;;  %s857_s25 = sand.u32 1, %s755_s11  }
  0x15   : > { %s504_s26 = sshll.u32 %s857_s25, 5  ;;  %s539_s27 = sshll.u32 %s763_s13, 9 }
  0x16   : > { %s1021_s24 = scalar_select %p850_p11, 1, 0 }
  0x17   : > { %s864_s30 = scalar_lea.hbm %s1013_s0, %s539_s27  ;;  %s150_s3 = scalar_lea.vmem [#allocation2], %s504_s26 }
  0x18   : > { %s159_s4 = sshll.u32 %s150_s3, 4  ;;  %p870_p0 = pnand %p558_p13, %p833_p4  ;;  %s866_s4 = int_to_ptr.vmem [resolvable:$true] %s159_s4 }
  0x19   : > { %s147_s6 = scalar_lea.sflag [#allocation3], %s857_s25  ;;  %s621_s7 = scalar_lea.hbm %s864_s30, 512 }
  0x1a   : > { %p622_p2 = scmp.ne.s32.totalorder %s864_s30, %s621_s7  ;;  %p623_p3 = pneg %p870_p0 }
  0x1b   : > { %s626_s16 = scalar_lea.hbm %s1013_s0, 1024  ;;  %p627_p4 = scmp.lt.u32.totalorder %s864_s30, %s1013_s0 }
  0x1c   : > { %p624_p5 = pnand %p623_p3, %p622_p2  ;;  %p628_p7 = scmp.lt.u32.totalorder %s626_s16, %s621_s7 }
  0x1d   : > { %p630_p13 = scmp.lt.u32.totalorder %s621_s7, %s864_s30 }
  0x1e   : > { %p625_p6 = pneg %p624_p5  ;;  %p629_p10 = por %p628_p7, %p627_p4 }
  0x20   : > { %p631_p12 = por %p630_p13, %p629_p10 }
  0x22   : > { %p632_p1 = pnand %p631_p12, %p625_p6 }
  0x24   : > { %635 = shalt.err (!%p632_p1)
}
  0x25   : > { %s636_s20 = scalar_lea.vmem %s866_s4, 512  ;;  %s769_s26 = smov [#allocation2]  }
  0x26   : > { %p637_p2 = scmp.ne.s32.totalorder %s866_s4, %s636_s20  ;;  %s641_s27 = sshll.u32 %s769_s26, 4  ;;  %s642_s27 = int_to_ptr.vmem [resolvable:$false] %s641_s27 }
  0x27   : > { %s643_s28 = scalar_lea.vmem %s642_s27, 1024  ;;  %p644_p9 = scmp.lt.s32.totalorder %s866_s4, %s642_s27 }
  0x28   : > { %p639_p5 = pnand %p637_p2, %p623_p3  ;;  %p645_p4 = scmp.lt.s32.totalorder %s643_s28, %s636_s20 }
  0x2a   : > { %p640_p11 = pneg %p639_p5  ;;  %p646_p7 = por %p645_p4, %p644_p9 }
  0x2c   : > { %p647_p10 = pnand %p646_p7, %p640_p11 }
  0x2e   : > { %650 = shalt.err (!%p647_p10)
}
  0x2f   : > { %s770_s29 = smov 128   ;;  %s771_s3 = smov 8  }
  0x30   : > { %550 = dma.hbm_to_vmem [thread:$0]  (!%p870_p0), %s864_s30, 512, %s866_s4, %s147_s6, %s770_s29, %s770_s29, %s771_s3  }
  0x31   : > { %p187_p12 = scmp.lt.s32.totalorder %s767_s14, 3  ;;  %s507_s7 = sshll.u32 %s857_s25, 3 }
  0x32   : > { %s508_s8 = sshll.u32 %s763_s13, 7  ;;  %p1023_p9 = scmp.ge.s32.totalorder %s767_s14, 1 }
  0x33   : > { %s915_s19 = scalar_lea.hbm %s1014_s1, %s508_s8  ;;  %s173_s20 = scalar_lea.vmem [#allocation5], %s507_s7 }
  0x34   : > { %p908_p11 = pnand %p1023_p9, %p187_p12  ;;  %s182_s26 = sshll.u32 %s173_s20, 4  ;;  %s183_s26 = int_to_ptr.vmem [resolvable:$true] %s182_s26 }
  0x35   : > { %s170_s30 = scalar_lea.sflag [#allocation6], %s857_s25  ;;  %s651_s4 = scalar_lea.hbm %s915_s19, 128 }
  0x36   : > { %s1024_s15 = scalar_select %p908_p11, 1, 0 }
  0x37   : > { %p652_p1 = scmp.ne.s32.totalorder %s915_s19, %s651_s4  ;;  %s656_s28 = scalar_lea.hbm %s1014_s1, 256 }
  0x38   : > { %p657_p2 = scmp.lt.u32.totalorder %s915_s19, %s1014_s1  ;;  %p658_p5 = scmp.lt.u32.totalorder %s656_s28, %s651_s4 }
  0x39   : > { %p654_p6 = pnand %p652_p1, %p623_p3  ;;  %p660_p7 = scmp.lt.u32.totalorder %s651_s4, %s915_s19 }
  0x3a   : > { %p659_p4 = por %p658_p5, %p657_p2 }
  0x3b   : > { %p655_p13 = pneg %p654_p6 }
  0x3c   : > { %p661_p10 = por %p660_p7, %p659_p4 }
  0x3e   : > { %p662_p12 = pnand %p661_p10, %p655_p13 }
  0x40   : > { %665 = shalt.err (!%p662_p12)
}
  0x41   : > { %s666_s25 = scalar_lea.vmem %s183_s26, 128  ;;  %s772_s7 = smov [#allocation5]  }
  0x42   : > { %p667_p9 = scmp.ne.s32.totalorder %s183_s26, %s666_s25  ;;  %s671_s8 = sshll.u32 %s772_s7, 4  ;;  %s672_s8 = int_to_ptr.vmem [resolvable:$false] %s671_s8 }
  0x43   : > { %s673_s16 = scalar_lea.vmem %s672_s8, 256  ;;  %p674_p8 = scmp.lt.s32.totalorder %s183_s26, %s672_s8 }
  0x44   : > { %p669_p1 = pnand %p667_p9, %p623_p3  ;;  %p675_p11 = scmp.lt.s32.totalorder %s673_s16, %s666_s25 }
  0x46   : > { %p670_p6 = pneg %p669_p1  ;;  %p676_p2 = por %p675_p11, %p674_p8 }
  0x48   : > { %p677_p5 = pnand %p676_p2, %p670_p6 }
  0x4a   : > { %680 = shalt.err (!%p677_p5)
}
  0x4b   : > { %553 = dma.hbm_to_vmem [thread:$0]  (!%p870_p0), %s915_s19, 128, %s183_s26, %s170_s30  }
  0x4c   : > { %p1025_p13 = scmp.ne.s32.totalorder %s1024_s15, 0 }
  0x4d   : > { %s940_s18 = sand.u32 (!%p1025_p13), 1, %s751_s10   ;;  %p1026_p8 = scmp.ne.s32.totalorder (!%p1025_p13), %s1019_s21, 0 }
  0x4e   : > { %191 = sbr.rel (%p1025_p13) target bundleno = 152 (0x98), region = 28  ;;  %s510_s20 = sshll.u32 (!%p1025_p13), %s940_s18, 5 }
  0x4f   : > { %s194_s4 = scalar_lea.sflag (!%p1025_p13), [#allocation3], %s940_s18  ;;  %s197_s6 = scalar_lea.vmem (!%p1025_p13), [#allocation2], %s510_s20 }
  0x55   : > { %734 = dma.done.wait (%p1026_p8), %s194_s4, 512  }
  0x56   : > { %736 = vsyncadd (%p1026_p8), %s194_s4, 4294966784  ;;  %s511_s5 = sshll.u32 %s940_s18, 3  ;;  %s203_s15 = scalar_lea.sflag [#allocation6], %s940_s18 }
  0x57   : > { %s206_s19 = scalar_lea.vmem [#allocation5], %s511_s5 }
  0x58   : > { %738 = dma.done.wait (%p1026_p8), %s203_s15, 128  }
  0x59   : > { %740 = vsyncadd (%p1026_p8), %s203_s15, 4294967168  ;;  %v337_v0 = vlaneseq  ;;  %v523_v5 = vld [vmem:[%s197_s6 + $0x18] sm:$0xff]  ;;  %v306_v6 = vld [vmem:[%s197_s6] sm:$0xff]  ;;  %v773_v13 = vmov 0.0   ;;  %s231_s21 = scalar_lea.vmem [#allocation7], %s510_s20  ;;  %s540_s26 = sshll.u32 %s759_s12, 9 }
  0x5a   : > { %v524_v7 = vld [vmem:[%s197_s6 + $0x8] sm:$0xff]  ;;  %v307_v8 = vsub.f32 %v306_v6, %v523_v5  ;;  %v525_v10 = vld [vmem:[%s197_s6 + $0x10] sm:$0xff]  ;;  %s385_s30 = sshll.u32 %s231_s21, 4  ;;  %s962_s29 = scalar_lea.hbm %s1015_s2, %s540_s26  ;;  %s964_s30 = int_to_ptr.vmem [resolvable:$true] %s385_s30 }
  0x5b   : > { %v338_v1 = vshrl.u32 %v337_v0, 7  ;;  %v340_v2 = vand.u32 127, %v337_v0  ;;  %v312_v9 = vsub.f32 %v524_v7, %v523_v5  ;;  %v329_v11 = vld [vmem:[%s206_s19] sm:$0xff]  ;;  %v318_v12 = vsub.f32 %v525_v10, %v523_v5  ;;  %s370_s3 = scalar_lea.sflag [#allocation4], %s940_s18  ;;  %s681_s25 = scalar_lea.vmem %s964_s30, 512 }
  0x5c   : > { %vm330_vm1 = vcmp.ne.s32.totalorder %v329_v11, 3  ;;  %vm331_vm2 = vcmp.ne.s32.totalorder %v329_v11, 255  ;;  %v308_v15 = vmul.f32 1.442695, %v307_v8  ;;  %p682_p0 = scmp.ne.s32.totalorder %s964_s30, %s681_s25  ;;  %p1027_p3 = scmp.ne.s32.totalorder %s1020_s22, 0 }
  0x5d   : > { %v341_v3 = vmul.u32 128, %v338_v1  ;;  %v313_v16 = vmul.f32 1.442695, %v312_v9  ;;  %vm332_vm3 = vmand %vm330_vm1, %vm331_vm2  ;;  %v319_v17 = vmul.f32 1.442695, %v318_v12  ;;  %s774_s12 = smov [#allocation7]  }
  0x5e   : > { %v526_v18 = vsel %vm332_vm3, 1.0, %v773_v13  ;;  %613 = vpow2.f32 %v308_v15  ;;  %p683_p11 = pnand %p682_p0, %p1027_p3  ;;  %s685_s7 = sshll.u32 %s774_s12, 4  ;;  %s686_s7 = int_to_ptr.vmem [resolvable:$false] %s685_s7 }
  0x5f   : > { %v342_v4 = vadd.s32 %v341_v3, %v340_v2  ;;  %615 = vpow2.f32 %v313_v16  ;;  %v335_v30 = vsub.f32 1.0, %v526_v18  ;;  %s687_s8 = scalar_lea.vmem %s686_s7, 1024  ;;  %p688_p7 = scmp.lt.s32.totalorder %s964_s30, %s686_s7 }
  0x60   : > { %617 = vpow2.f32 %v319_v17  ;;  %p684_p4 = pneg %p683_p11  ;;  %p689_p10 = scmp.lt.s32.totalorder %s687_s8, %s681_s25 }
  0x61   : > { %vm343_vm0 = vcmp.lt.s32.totalorder %v342_v4, 256 }
  0x62   : > { %v527_v14 = vsel %vm343_vm0, 1.0, %v773_v13  ;;  %p690_p12 = por %p689_p10, %p688_p7 }
  0x63   : > { %v347_v19 = vmul.f32 %v527_v14, %v526_v18 }
  0x64   : > { %p691_p9 = pnand %p690_p12, %p684_p4 }
  0x65   : > { %529 = vst [vmem:[%s231_s21 + $0x8] sm:$0xff] %v347_v19 }
  0x68   : > { %v614_v20 = vpop.eup %613 }
  0x69   : > { %v616_v21 = vpop.eup %615 }
  0x6a   : > { %v618_v22 = vpop.eup %617  ;;  %v315_v23 = vadd.f32 %v616_v21, %v614_v20 }
  0x6c   : > { %v321_v24 = vadd.f32 %v618_v22, %v315_v23 }
  0x6e   : > { %v322_v25 = vadd.f32 1.0, %v321_v24 }
  0x70   : > { %v323_v26 = vmin.f32 %v322_v25, 3e+38 }
  0x72   : > { %619 = vrcp.f32 %v323_v26 }
  0x7c   : > { %v620_v27 = vpop.eup %619 }
  0x7d   : > { %v325_v28 = vmul.f32 %v620_v27, %v323_v26 }
  0x7f   : > { %v326_v29 = vsub.f32 2.0, %v325_v28 }
  0x81   : > { %v327_v31 = vmul.f32 %v620_v27, %v326_v29 }
  0x83   : > { %v328_v32 = vsub.f32 1.0, %v327_v31  ;;  %v336_v33 = vmul.f32 %v335_v30, %v327_v31 }
  0x85   : > { %v346_v34 = vmul.f32 %v527_v14, %v328_v32  ;;  %v348_v35 = vmul.f32 %v527_v14, %v336_v33 }
  0x87   : > { %v360_v36 = vmul.f32 %v347_v19, %v346_v34  ;;  %352 = vst [vmem:[%s231_s21] sm:$0xff] %v346_v34  ;;  %533 = vst [vmem:[%s231_s21 + $0x18] sm:$0xff] %v348_v35 }
  0x89   : > { %531 = vst [vmem:[%s231_s21 + $0x10] sm:$0xff] %v360_v36 }
  0x8a   : > { %694 = shalt.err (!%p691_p9)
}
  0x8b   : > { %s695_s16 = scalar_lea.hbm %s962_s29, 512  ;;  %s699_s6 = scalar_lea.hbm %s1015_s2, 1024 }
  0x8c   : > { %p696_p1 = scmp.ne.s32.totalorder %s962_s29, %s695_s16  ;;  %p700_p5 = scmp.lt.u32.totalorder %s962_s29, %s1015_s2 }
  0x8d   : > { %p701_p13 = scmp.lt.u32.totalorder %s699_s6, %s695_s16  ;;  %p703_p0 = scmp.lt.u32.totalorder %s695_s16, %s962_s29 }
  0x8e   : > { %p697_p6 = pnand %p696_p1, %p1027_p3 }
  0x8f   : > { %p702_p8 = por %p701_p13, %p700_p5 }
  0x90   : > { %p698_p2 = pneg %p697_p6 }
  0x91   : > { %p704_p11 = por %p703_p0, %p702_p8 }
  0x93   : > { %p705_p4 = pnand %p704_p11, %p698_p2 }
  0x95   : > { %708 = shalt.err (!%p705_p4)
}
  0x96   : > { %s775_s19 = smov 128   ;;  %s776_s21 = smov 8  }
  0x97   : > { %545 = dma.vmem_to_hbm [thread:$0]  (%p1027_p3), %s964_s30, 512, %s962_s29, %s370_s3, %s775_s19, %s775_s19, %s776_s21  }
  0x98 PF: > { %s400_s26 = sand.u32 1, %s747_s9   ;;  %p1028_p7 = scmp.ne.s32.totalorder %s1021_s24, 0 }
  0x99   : > { %p1029_p10 = scmp.ge.s32.totalorder %s767_s14, 2  ;;  %s401_s27 = scalar_lea.sflag [#allocation4], %s400_s26 }
  0x9b   : > { %p555_p12 = pnand %p1029_p10, %p1028_p7 }
  0x9d   : > { %742 = dma.done.wait (!%p555_p12), %s401_s27, 512  }
  0x9e   : > { %744 = vsyncadd (!%p555_p12), %s401_s27, 4294966784  ;;  %s21_s14 = sadd.s32 1, %s767_s14   ;;  %s1030_s9 = smov %s751_s10 }
  0x9f   : > { %p18_p9 = scmp.ge.s32.totalorder %s21_s14, 4   ;;  %s1031_s10 = smov %s755_s11 }
  0xa0   : > { %s1032_s11 = smov %s848_s23  ;;  %s1033_s12 = smov %s763_s13 }
  0xa1   : > { %s1034_s13 = smov %s1036_s17  ;;  %20 = sbr.rel (!%p18_p9) target bundleno = 8 (0x8), region = 110 }
  0xa8   :  { %406 = vsyncpa [#allocation3], 1 }
  0xa9   :  { %408 = vsyncpa [#allocation3 + $0x1], 1 }
  0xaa   :  { %409 = vsyncpa [#allocation6], 1 }
  0xab   :  { %411 = vsyncpa [#allocation6 + $0x1], 1 }
  0xac   :  { %412 = vsyncpa [#allocation4], 1 }
  0xad   :  { %414 = vsyncpa [#allocation4 + $0x1], 1 }

</bundles_post_ra>
